<compile_context>
chip_gen: v6e
topology: v6e:2x2x1
jax: 0.10.0
libtpu: 0.0.40
codegen_flags: <defaults>
</compile_context>

<pallas_src>
import functools

import jax
import jax.numpy as jnp
import numpy as np
from jax.experimental import pallas as pl
from jax.experimental.pallas import tpu as pltpu


def _round_up(x, m):
    return (x + m - 1) // m * m


def _tap_masks(H, W):
    """(9, H*W) float32 0/1 masks: tap (di,dj) is valid iff the shifted pixel is in-image."""
    HW = H * W
    h = np.arange(HW) // W
    w = np.arange(HW) % W
    m = np.zeros((9, HW), np.float32)
    for di in range(3):
        for dj in range(3):
            dr, dc = di - 1, dj - 1
            ok = (h + dr >= 0) & (h + dr < H) & (w + dc >= 0) & (w + dc < W)
            m[di * 3 + dj] = ok.astype(np.float32)
    return m


def _regmap_kernel(x_ref, wf_ref, m_ref, o_ref, *scratch, C, H, W, nb, use_mxu):
    # x_ref : (nb, C, H*W)        input block, spatial flattened (lane-dense)
    # wf_ref: MXU path -> (16, C) f32 VMEM (taps 9..15 are zero padding)
    #         VPU path -> (9*C,)  f32 SMEM, idx = t*C + c
    # m_ref : (9, H*W) f32        0/1 border-validity masks per tap (resident)
    # o_ref : (nb, H*W)           output block (dense lane/sublane stores)
    # scratch (MXU path only): (nb, 16, H*W) f32 taps buffer
    HW = H * W
    f32 = jnp.float32

    if use_mxu:
        taps_ref = scratch[0]
        wf = wf_ref[...].astype(f32)                      # (16, C), shared across samples

        def _mm(i, carry):
            # one thin (16, C) @ (C, HW) matmul per sample on the MXU
            taps_ref[i] = jnp.dot(wf, x_ref[i].astype(f32),
                                  preferred_element_type=f32)
            return carry

        jax.lax.fori_loop(0, nb, _mm, 0, unroll=nb <= 8)

        def tap(t):
            return taps_ref[:, t, :]                      # (nb, HW) dense slab
    else:
        # Small-C path: channel-outer / tap-inner VPU reduction.  Each channel
        # row is loaded exactly once; the 9 (nb, HW) accumulators stay live.
        accs = [None] * 9
        for c in range(C):
            xc = x_ref[:, c, :].astype(f32)               # (nb, HW)
            for t in range(9):
                term = xc * wf_ref[t * C + c]             # scalar splat from SMEM
                accs[t] = term if accs[t] is None else accs[t] + term

        def tap(t):
            return accs[t]

    # Halo handling: per-tap lane rotation + 0/1 border mask, summed over taps.
    acc = None
    for t in range(9):
        dr, dc = t // 3 - 1, t % 3 - 1
        s = dr * W + dc                                   # flat-index offset of this tap
        z = tap(t)
        if s != 0:
            z = pltpu.roll(z, shift=(-s) % HW, axis=1)    # rolled[p] = z[(p + s) mod HW]
        if not (dr == 0 and dc == 0):
            z = z * m_ref[t:t + 1, :]                     # zero wrapped / out-of-image lanes
        acc = z if acc is None else acc + z

    # exact sigmoid on the EUP: sigmoid(x) = 0.5 * tanh(0.5 x) + 0.5
    o_ref[...] = (0.5 * jnp.tanh(0.5 * acc) + 0.5).astype(o_ref.dtype)


def _vmem_budget():
    """(block-sizing budget, vmem_limit_bytes) per TPU generation."""
    try:
        cap = int(pltpu.get_tpu_info().vmem_capacity_bytes)
    except Exception:
        cap = 64 * 1024 * 1024                            # conservative default
    if cap >= 128 * 1024 * 1024:                          # v5e / v6e: 128 MiB
        return 48 * 1024 * 1024, 64 * 1024 * 1024
    return 28 * 1024 * 1024, 44 * 1024 * 1024             # v7x-class: 64 MiB per TC


def _pick_batch_block(N, C, HW, x_itemsize, budget, use_mxu):
    HWp = _round_up(HW, 128)
    Cp = _round_up(C, 8)

    def block_bytes(nb):
        nbp = _round_up(nb, 8)
        b = 2 * nb * Cp * HWp * x_itemsize                # double-buffered input block
        b += 2 * nbp * HWp * 4                            # double-buffered f32 output block
        b += 2 * 16 * HWp * 4                             # resident (9->16, HW) border masks
        if use_mxu:
            b += nb * 16 * HWp * 4                        # (nb, 16, HW) f32 taps scratch
            b += 3 * nbp * HWp * 4                        # live accumulator / temporaries
        else:
            b += 10 * nbp * HWp * 4                       # 9 accumulators + temporaries
        return b

    if N <= 8:
        return N          # single block: splitting tiny batches only de-densifies sublanes

    nb, cand = 8, 8
    while cand <= N and block_bytes(cand) <= budget:
        nb = cand
        cand += 8
    for d in range(nb, 7, -8):                            # prefer no ragged last block
        if N % d == 0:
            return d
    return nb


def regression_map_forward(x, dw, pw, *, batch_block=None, use_mxu=None):
    """x: (N, C, H, W) f32/bf16; dw: (C, 3, 3); pw: (1, C) -> (mask (N,1,H,W) f32, None)."""
    N, C, H, W = x.shape
    HW = H * W

    if use_mxu is None:
        # thin-matmul issue overhead only beats the VPU splat chain at realistic C
        use_mxu = C >= 16

    # Fuse pointwise into depthwise (exact -- the pointwise conv is linear):
    #   y = sum_c sum_ij x_pad[c, h+i, w+j] * dw[c,i,j] * pw[0,c]
    wf9c = (dw.astype(jnp.float32) * pw[0].astype(jnp.float32)[:, None, None])  # (C, 3, 3)
    wf9c = wf9c.reshape(C, 9).T                                                 # (9, C)

    if use_mxu:
        wf_arg = jnp.zeros((16, C), jnp.float32).at[:9].set(wf9c)   # pad taps to 16 rows
        wf_spec = pl.BlockSpec((16, C), lambda n: (0, 0))
    else:
        wf_arg = wf9c.reshape(9 * C)
        wf_spec = pl.BlockSpec(memory_space=pltpu.MemorySpace.SMEM)

    x_flat = x.reshape(N, C, HW)                  # free, row-major
    masks = jnp.asarray(_tap_masks(H, W))         # (9, HW), fetched once (constant index_map)

    budget, vmem_limit = _vmem_budget()
    nb = batch_block or _pick_batch_block(N, C, HW, x.dtype.itemsize, budget, use_mxu)
    nb = int(nb)
    grid = (pl.cdiv(N, nb),)

    scratch = [pltpu.VMEM((nb, 16, HW), jnp.float32)] if use_mxu else []
    kernel = functools.partial(_regmap_kernel, C=C, H=H, W=W, nb=nb, use_mxu=use_mxu)

    out = pl.pallas_call(
        kernel,
        out_shape=jax.ShapeDtypeStruct((N, HW), jnp.float32),
        grid_spec=pltpu.PrefetchScalarGridSpec(
            num_scalar_prefetch=0,
            grid=grid,
            in_specs=[
                pl.BlockSpec((nb, C, HW), lambda n: (n, 0, 0)),   # input block (full C, HW)
                wf_spec,                                          # fused weights
                pl.BlockSpec((9, HW), lambda n: (0, 0)),          # border masks (resident)
            ],
            out_specs=pl.BlockSpec((nb, HW), lambda n: (n, 0)),   # dense 2-D output rows
            scratch_shapes=scratch,
        ),
        compiler_params=pltpu.CompilerParams(
            dimension_semantics=("parallel",),
            vmem_limit_bytes=vmem_limit,
        ),
    )(x_flat, wf_arg, masks)

    return out.reshape(N, 1, H, W), None


def _reference(x, dw, pw):
    # plain-JAX reference (matches PyTorch cross-correlation semantics)
    N, C, H, W = x.shape
    xp = jnp.pad(x.astype(jnp.float32), ((0, 0), (0, 0), (1, 1), (1, 1)))
    acc = jnp.zeros((N, C, H, W), jnp.float32)
    for di in range(3):
        for dj in range(3):
            acc = acc + xp[:, :, di:di + H, dj:dj + W] * dw[None, :, di, dj, None, None]
    y = jnp.sum(acc * pw[0][None, :, None, None], axis=1, keepdims=True)
    return jax.nn.sigmoid(y)


if __name__ == "__main__":
    def run_case(N, C, H, W, dtype, atol, key):
        kx, kd, kp = jax.random.split(key, 3)
        x = jax.random.normal(kx, (N, C, H, W), dtype=jnp.float32).astype(dtype)
        dw = 0.1 * jax.random.normal(kd, (C, 3, 3), dtype=jnp.float32)
        pw = 0.1 * jax.random.normal(kp, (1, C), dtype=jnp.float32)

        mask, none_out = regression_map_forward(x, dw, pw)
        mask = jax.block_until_ready(mask)

        ref = _reference(x.astype(jnp.float32), dw, pw)
        assert mask.shape == (N, 1, H, W)
        assert none_out is None
        err = float(jnp.max(jnp.abs(mask - ref)))
        assert err < atol, (N, C, H, W, str(dtype), err)

    key = jax.random.PRNGKey(0)
    k1, k2, k3 = jax.random.split(key, 3)

    # module-spec shape: tiny C -> VPU channel-reduction path, exact f32 math
    run_case(2, 4, 16, 16, jnp.float32, 1e-5, k1)
    # realistic C -> channel reduction on the MXU (f32 matmul may use multi-pass
    # bf16 emulation on the MXU, hence the slightly looser tolerance)
    run_case(16, 32, 16, 16, jnp.float32, 5e-3, k2)
    # ragged grid (N % nb != 0) + bf16 activations (kernel upcasts internally)
    run_case(20, 32, 16, 16, jnp.bfloat16, 5e-3, k3)

    print("KERNEL_OK")
</pallas_src>

<mosaic_0001>
module attributes {stable_mosaic.version = 11 : i64} {
  func.func @_regmap_kernel(%arg0: i32, %arg1: memref<2x4x256xf32, #tpu.memory_space<vmem>>, %arg2: memref<36xf32, #tpu.memory_space<smem>>, %arg3: memref<9x256xf32, #tpu.memory_space<vmem>>, %arg4: memref<2x256xf32, #tpu.memory_space<vmem>>) attributes {dimension_semantics = [#tpu.dimension_semantics<parallel>], iteration_bounds = array<i64: 1>, scalar_prefetch = 0 : i64, scratch_operands = 0 : i64, tpu.core_type = #tpu.core_type<tc>, window_params = [{transform_indices = @transform_0, window_bounds = array<i64: 2, 4, 256>}, {transform_indices = @transform_1, window_bounds = array<i64: 36>}, {pipeline_mode = #tpu.pipeline_mode<synchronous>, transform_indices = @transform_2, window_bounds = array<i64: 9, 256>}, {transform_indices = @transform_3, window_bounds = array<i64: 2, 256>}]} {
    %c0 = arith.constant 0 : index
    %c0_0 = arith.constant 0 : index
    %c0_1 = arith.constant 0 : index
    %0 = vector.load %arg1[%c0, %c0_0, %c0_1] : memref<2x4x256xf32, #tpu.memory_space<vmem>>, vector<2x1x256xf32>
    %1 = vector.shape_cast %0 : vector<2x1x256xf32> to vector<2x256xf32>
    %c0_2 = arith.constant 0 : index
    %2 = memref.load %arg2[%c0_2] : memref<36xf32, #tpu.memory_space<smem>>
    %3 = vector.broadcast %2 : f32 to vector<2x256xf32>
    %4 = arith.mulf %1, %3 : vector<2x256xf32>
    %c4 = arith.constant 4 : index
    %5 = memref.load %arg2[%c4] : memref<36xf32, #tpu.memory_space<smem>>
    %6 = vector.broadcast %5 : f32 to vector<2x256xf32>
    %7 = arith.mulf %1, %6 : vector<2x256xf32>
    %c8 = arith.constant 8 : index
    %8 = memref.load %arg2[%c8] : memref<36xf32, #tpu.memory_space<smem>>
    %9 = vector.broadcast %8 : f32 to vector<2x256xf32>
    %10 = arith.mulf %1, %9 : vector<2x256xf32>
    %c12 = arith.constant 12 : index
    %11 = memref.load %arg2[%c12] : memref<36xf32, #tpu.memory_space<smem>>
    %12 = vector.broadcast %11 : f32 to vector<2x256xf32>
    %13 = arith.mulf %1, %12 : vector<2x256xf32>
    %c16 = arith.constant 16 : index
    %14 = memref.load %arg2[%c16] : memref<36xf32, #tpu.memory_space<smem>>
    %15 = vector.broadcast %14 : f32 to vector<2x256xf32>
    %16 = arith.mulf %1, %15 : vector<2x256xf32>
    %c20 = arith.constant 20 : index
    %17 = memref.load %arg2[%c20] : memref<36xf32, #tpu.memory_space<smem>>
    %18 = vector.broadcast %17 : f32 to vector<2x256xf32>
    %19 = arith.mulf %1, %18 : vector<2x256xf32>
    %c24 = arith.constant 24 : index
    %20 = memref.load %arg2[%c24] : memref<36xf32, #tpu.memory_space<smem>>
    %21 = vector.broadcast %20 : f32 to vector<2x256xf32>
    %22 = arith.mulf %1, %21 : vector<2x256xf32>
    %c28 = arith.constant 28 : index
    %23 = memref.load %arg2[%c28] : memref<36xf32, #tpu.memory_space<smem>>
    %24 = vector.broadcast %23 : f32 to vector<2x256xf32>
    %25 = arith.mulf %1, %24 : vector<2x256xf32>
    %c32 = arith.constant 32 : index
    %26 = memref.load %arg2[%c32] : memref<36xf32, #tpu.memory_space<smem>>
    %27 = vector.broadcast %26 : f32 to vector<2x256xf32>
    %28 = arith.mulf %1, %27 : vector<2x256xf32>
    %c0_3 = arith.constant 0 : index
    %c1 = arith.constant 1 : index
    %c0_4 = arith.constant 0 : index
    %29 = vector.load %arg1[%c0_3, %c1, %c0_4] : memref<2x4x256xf32, #tpu.memory_space<vmem>>, vector<2x1x256xf32>
    %30 = vector.shape_cast %29 : vector<2x1x256xf32> to vector<2x256xf32>
    %c1_5 = arith.constant 1 : index
    %31 = memref.load %arg2[%c1_5] : memref<36xf32, #tpu.memory_space<smem>>
    %32 = vector.broadcast %31 : f32 to vector<2x256xf32>
    %33 = arith.mulf %30, %32 : vector<2x256xf32>
    %34 = arith.addf %4, %33 : vector<2x256xf32>
    %c5 = arith.constant 5 : index
    %35 = memref.load %arg2[%c5] : memref<36xf32, #tpu.memory_space<smem>>
    %36 = vector.broadcast %35 : f32 to vector<2x256xf32>
    %37 = arith.mulf %30, %36 : vector<2x256xf32>
    %38 = arith.addf %7, %37 : vector<2x256xf32>
    %c9 = arith.constant 9 : index
    %39 = memref.load %arg2[%c9] : memref<36xf32, #tpu.memory_space<smem>>
    %40 = vector.broadcast %39 : f32 to vector<2x256xf32>
    %41 = arith.mulf %30, %40 : vector<2x256xf32>
    %42 = arith.addf %10, %41 : vector<2x256xf32>
    %c13 = arith.constant 13 : index
    %43 = memref.load %arg2[%c13] : memref<36xf32, #tpu.memory_space<smem>>
    %44 = vector.broadcast %43 : f32 to vector<2x256xf32>
    %45 = arith.mulf %30, %44 : vector<2x256xf32>
    %46 = arith.addf %13, %45 : vector<2x256xf32>
    %c17 = arith.constant 17 : index
    %47 = memref.load %arg2[%c17] : memref<36xf32, #tpu.memory_space<smem>>
    %48 = vector.broadcast %47 : f32 to vector<2x256xf32>
    %49 = arith.mulf %30, %48 : vector<2x256xf32>
    %50 = arith.addf %16, %49 : vector<2x256xf32>
    %c21 = arith.constant 21 : index
    %51 = memref.load %arg2[%c21] : memref<36xf32, #tpu.memory_space<smem>>
    %52 = vector.broadcast %51 : f32 to vector<2x256xf32>
    %53 = arith.mulf %30, %52 : vector<2x256xf32>
    %54 = arith.addf %19, %53 : vector<2x256xf32>
    %c25 = arith.constant 25 : index
    %55 = memref.load %arg2[%c25] : memref<36xf32, #tpu.memory_space<smem>>
    %56 = vector.broadcast %55 : f32 to vector<2x256xf32>
    %57 = arith.mulf %30, %56 : vector<2x256xf32>
    %58 = arith.addf %22, %57 : vector<2x256xf32>
    %c29 = arith.constant 29 : index
    %59 = memref.load %arg2[%c29] : memref<36xf32, #tpu.memory_space<smem>>
    %60 = vector.broadcast %59 : f32 to vector<2x256xf32>
    %61 = arith.mulf %30, %60 : vector<2x256xf32>
    %62 = arith.addf %25, %61 : vector<2x256xf32>
    %c33 = arith.constant 33 : index
    %63 = memref.load %arg2[%c33] : memref<36xf32, #tpu.memory_space<smem>>
    %64 = vector.broadcast %63 : f32 to vector<2x256xf32>
    %65 = arith.mulf %30, %64 : vector<2x256xf32>
    %66 = arith.addf %28, %65 : vector<2x256xf32>
    %c0_6 = arith.constant 0 : index
    %c2 = arith.constant 2 : index
    %c0_7 = arith.constant 0 : index
    %67 = vector.load %arg1[%c0_6, %c2, %c0_7] : memref<2x4x256xf32, #tpu.memory_space<vmem>>, vector<2x1x256xf32>
    %68 = vector.shape_cast %67 : vector<2x1x256xf32> to vector<2x256xf32>
    %c2_8 = arith.constant 2 : index
    %69 = memref.load %arg2[%c2_8] : memref<36xf32, #tpu.memory_space<smem>>
    %70 = vector.broadcast %69 : f32 to vector<2x256xf32>
    %71 = arith.mulf %68, %70 : vector<2x256xf32>
    %72 = arith.addf %34, %71 : vector<2x256xf32>
    %c6 = arith.constant 6 : index
    %73 = memref.load %arg2[%c6] : memref<36xf32, #tpu.memory_space<smem>>
    %74 = vector.broadcast %73 : f32 to vector<2x256xf32>
    %75 = arith.mulf %68, %74 : vector<2x256xf32>
    %76 = arith.addf %38, %75 : vector<2x256xf32>
    %c10 = arith.constant 10 : index
    %77 = memref.load %arg2[%c10] : memref<36xf32, #tpu.memory_space<smem>>
    %78 = vector.broadcast %77 : f32 to vector<2x256xf32>
    %79 = arith.mulf %68, %78 : vector<2x256xf32>
    %80 = arith.addf %42, %79 : vector<2x256xf32>
    %c14 = arith.constant 14 : index
    %81 = memref.load %arg2[%c14] : memref<36xf32, #tpu.memory_space<smem>>
    %82 = vector.broadcast %81 : f32 to vector<2x256xf32>
    %83 = arith.mulf %68, %82 : vector<2x256xf32>
    %84 = arith.addf %46, %83 : vector<2x256xf32>
    %c18 = arith.constant 18 : index
    %85 = memref.load %arg2[%c18] : memref<36xf32, #tpu.memory_space<smem>>
    %86 = vector.broadcast %85 : f32 to vector<2x256xf32>
    %87 = arith.mulf %68, %86 : vector<2x256xf32>
    %88 = arith.addf %50, %87 : vector<2x256xf32>
    %c22 = arith.constant 22 : index
    %89 = memref.load %arg2[%c22] : memref<36xf32, #tpu.memory_space<smem>>
    %90 = vector.broadcast %89 : f32 to vector<2x256xf32>
    %91 = arith.mulf %68, %90 : vector<2x256xf32>
    %92 = arith.addf %54, %91 : vector<2x256xf32>
    %c26 = arith.constant 26 : index
    %93 = memref.load %arg2[%c26] : memref<36xf32, #tpu.memory_space<smem>>
    %94 = vector.broadcast %93 : f32 to vector<2x256xf32>
    %95 = arith.mulf %68, %94 : vector<2x256xf32>
    %96 = arith.addf %58, %95 : vector<2x256xf32>
    %c30 = arith.constant 30 : index
    %97 = memref.load %arg2[%c30] : memref<36xf32, #tpu.memory_space<smem>>
    %98 = vector.broadcast %97 : f32 to vector<2x256xf32>
    %99 = arith.mulf %68, %98 : vector<2x256xf32>
    %100 = arith.addf %62, %99 : vector<2x256xf32>
    %c34 = arith.constant 34 : index
    %101 = memref.load %arg2[%c34] : memref<36xf32, #tpu.memory_space<smem>>
    %102 = vector.broadcast %101 : f32 to vector<2x256xf32>
    %103 = arith.mulf %68, %102 : vector<2x256xf32>
    %104 = arith.addf %66, %103 : vector<2x256xf32>
    %c0_9 = arith.constant 0 : index
    %c3 = arith.constant 3 : index
    %c0_10 = arith.constant 0 : index
    %105 = vector.load %arg1[%c0_9, %c3, %c0_10] : memref<2x4x256xf32, #tpu.memory_space<vmem>>, vector<2x1x256xf32>
    %106 = vector.shape_cast %105 : vector<2x1x256xf32> to vector<2x256xf32>
    %c3_11 = arith.constant 3 : index
    %107 = memref.load %arg2[%c3_11] : memref<36xf32, #tpu.memory_space<smem>>
    %108 = vector.broadcast %107 : f32 to vector<2x256xf32>
    %109 = arith.mulf %106, %108 : vector<2x256xf32>
    %110 = arith.addf %72, %109 : vector<2x256xf32>
    %c7 = arith.constant 7 : index
    %111 = memref.load %arg2[%c7] : memref<36xf32, #tpu.memory_space<smem>>
    %112 = vector.broadcast %111 : f32 to vector<2x256xf32>
    %113 = arith.mulf %106, %112 : vector<2x256xf32>
    %114 = arith.addf %76, %113 : vector<2x256xf32>
    %c11 = arith.constant 11 : index
    %115 = memref.load %arg2[%c11] : memref<36xf32, #tpu.memory_space<smem>>
    %116 = vector.broadcast %115 : f32 to vector<2x256xf32>
    %117 = arith.mulf %106, %116 : vector<2x256xf32>
    %118 = arith.addf %80, %117 : vector<2x256xf32>
    %c15 = arith.constant 15 : index
    %119 = memref.load %arg2[%c15] : memref<36xf32, #tpu.memory_space<smem>>
    %120 = vector.broadcast %119 : f32 to vector<2x256xf32>
    %121 = arith.mulf %106, %120 : vector<2x256xf32>
    %122 = arith.addf %84, %121 : vector<2x256xf32>
    %c19 = arith.constant 19 : index
    %123 = memref.load %arg2[%c19] : memref<36xf32, #tpu.memory_space<smem>>
    %124 = vector.broadcast %123 : f32 to vector<2x256xf32>
    %125 = arith.mulf %106, %124 : vector<2x256xf32>
    %126 = arith.addf %88, %125 : vector<2x256xf32>
    %c23 = arith.constant 23 : index
    %127 = memref.load %arg2[%c23] : memref<36xf32, #tpu.memory_space<smem>>
    %128 = vector.broadcast %127 : f32 to vector<2x256xf32>
    %129 = arith.mulf %106, %128 : vector<2x256xf32>
    %130 = arith.addf %92, %129 : vector<2x256xf32>
    %c27 = arith.constant 27 : index
    %131 = memref.load %arg2[%c27] : memref<36xf32, #tpu.memory_space<smem>>
    %132 = vector.broadcast %131 : f32 to vector<2x256xf32>
    %133 = arith.mulf %106, %132 : vector<2x256xf32>
    %134 = arith.addf %96, %133 : vector<2x256xf32>
    %c31 = arith.constant 31 : index
    %135 = memref.load %arg2[%c31] : memref<36xf32, #tpu.memory_space<smem>>
    %136 = vector.broadcast %135 : f32 to vector<2x256xf32>
    %137 = arith.mulf %106, %136 : vector<2x256xf32>
    %138 = arith.addf %100, %137 : vector<2x256xf32>
    %c35 = arith.constant 35 : index
    %139 = memref.load %arg2[%c35] : memref<36xf32, #tpu.memory_space<smem>>
    %140 = vector.broadcast %139 : f32 to vector<2x256xf32>
    %141 = arith.mulf %106, %140 : vector<2x256xf32>
    %142 = arith.addf %104, %141 : vector<2x256xf32>
    %c17_i32 = arith.constant 17 : i32
    %143 = tpu.dynamic_rotate %110 by %c17_i32 dim 1 : vector<2x256xf32>, i32 -> vector<2x256xf32>
    %c0_12 = arith.constant 0 : index
    %c0_13 = arith.constant 0 : index
    %144 = vector.load %arg3[%c0_12, %c0_13] : memref<9x256xf32, #tpu.memory_space<vmem>>, vector<1x256xf32>
    %145 = vector.broadcast %144 : vector<1x256xf32> to vector<2x256xf32>
    %146 = arith.mulf %143, %145 : vector<2x256xf32>
    %c16_i32 = arith.constant 16 : i32
    %147 = tpu.dynamic_rotate %114 by %c16_i32 dim 1 : vector<2x256xf32>, i32 -> vector<2x256xf32>
    %c1_14 = arith.constant 1 : index
    %c0_15 = arith.constant 0 : index
    %148 = vector.load %arg3[%c1_14, %c0_15] : memref<9x256xf32, #tpu.memory_space<vmem>>, vector<1x256xf32>
    %149 = vector.broadcast %148 : vector<1x256xf32> to vector<2x256xf32>
    %150 = arith.mulf %147, %149 : vector<2x256xf32>
    %151 = arith.addf %146, %150 : vector<2x256xf32>
    %c15_i32 = arith.constant 15 : i32
    %152 = tpu.dynamic_rotate %118 by %c15_i32 dim 1 : vector<2x256xf32>, i32 -> vector<2x256xf32>
    %c2_16 = arith.constant 2 : index
    %c0_17 = arith.constant 0 : index
    %153 = vector.load %arg3[%c2_16, %c0_17] : memref<9x256xf32, #tpu.memory_space<vmem>>, vector<1x256xf32>
    %154 = vector.broadcast %153 : vector<1x256xf32> to vector<2x256xf32>
    %155 = arith.mulf %152, %154 : vector<2x256xf32>
    %156 = arith.addf %151, %155 : vector<2x256xf32>
    %c1_i32 = arith.constant 1 : i32
    %157 = tpu.dynamic_rotate %122 by %c1_i32 dim 1 : vector<2x256xf32>, i32 -> vector<2x256xf32>
    %c3_18 = arith.constant 3 : index
    %c0_19 = arith.constant 0 : index
    %158 = vector.load %arg3[%c3_18, %c0_19] : memref<9x256xf32, #tpu.memory_space<vmem>>, vector<1x256xf32>
    %159 = vector.broadcast %158 : vector<1x256xf32> to vector<2x256xf32>
    %160 = arith.mulf %157, %159 : vector<2x256xf32>
    %161 = arith.addf %156, %160 : vector<2x256xf32>
    %162 = arith.addf %161, %126 : vector<2x256xf32>
    %c255_i32 = arith.constant 255 : i32
    %163 = tpu.dynamic_rotate %130 by %c255_i32 dim 1 : vector<2x256xf32>, i32 -> vector<2x256xf32>
    %c5_20 = arith.constant 5 : index
    %c0_21 = arith.constant 0 : index
    %164 = vector.load %arg3[%c5_20, %c0_21] : memref<9x256xf32, #tpu.memory_space<vmem>>, vector<1x256xf32>
    %165 = vector.broadcast %164 : vector<1x256xf32> to vector<2x256xf32>
    %166 = arith.mulf %163, %165 : vector<2x256xf32>
    %167 = arith.addf %162, %166 : vector<2x256xf32>
    %c241_i32 = arith.constant 241 : i32
    %168 = tpu.dynamic_rotate %134 by %c241_i32 dim 1 : vector<2x256xf32>, i32 -> vector<2x256xf32>
    %c6_22 = arith.constant 6 : index
    %c0_23 = arith.constant 0 : index
    %169 = vector.load %arg3[%c6_22, %c0_23] : memref<9x256xf32, #tpu.memory_space<vmem>>, vector<1x256xf32>
    %170 = vector.broadcast %169 : vector<1x256xf32> to vector<2x256xf32>
    %171 = arith.mulf %168, %170 : vector<2x256xf32>
    %172 = arith.addf %167, %171 : vector<2x256xf32>
    %c240_i32 = arith.constant 240 : i32
    %173 = tpu.dynamic_rotate %138 by %c240_i32 dim 1 : vector<2x256xf32>, i32 -> vector<2x256xf32>
    %c7_24 = arith.constant 7 : index
    %c0_25 = arith.constant 0 : index
    %174 = vector.load %arg3[%c7_24, %c0_25] : memref<9x256xf32, #tpu.memory_space<vmem>>, vector<1x256xf32>
    %175 = vector.broadcast %174 : vector<1x256xf32> to vector<2x256xf32>
    %176 = arith.mulf %173, %175 : vector<2x256xf32>
    %177 = arith.addf %172, %176 : vector<2x256xf32>
    %c239_i32 = arith.constant 239 : i32
    %178 = tpu.dynamic_rotate %142 by %c239_i32 dim 1 : vector<2x256xf32>, i32 -> vector<2x256xf32>
    %c8_26 = arith.constant 8 : index
    %c0_27 = arith.constant 0 : index
    %179 = vector.load %arg3[%c8_26, %c0_27] : memref<9x256xf32, #tpu.memory_space<vmem>>, vector<1x256xf32>
    %180 = vector.broadcast %179 : vector<1x256xf32> to vector<2x256xf32>
    %181 = arith.mulf %178, %180 : vector<2x256xf32>
    %182 = arith.addf %177, %181 : vector<2x256xf32>
    %cst = arith.constant 5.000000e-01 : f32
    %183 = vector.broadcast %cst : f32 to vector<2x256xf32>
    %184 = arith.mulf %183, %182 : vector<2x256xf32>
    %185 = math.tanh %184 : vector<2x256xf32>
    %cst_28 = arith.constant 5.000000e-01 : f32
    %186 = vector.broadcast %cst_28 : f32 to vector<2x256xf32>
    %187 = arith.mulf %186, %185 : vector<2x256xf32>
    %cst_29 = arith.constant 5.000000e-01 : f32
    %188 = vector.broadcast %cst_29 : f32 to vector<2x256xf32>
    %189 = arith.addf %187, %188 : vector<2x256xf32>
    %c0_30 = arith.constant 0 : index
    %c0_31 = arith.constant 0 : index
    %190 = vector.load %arg4[%c0_30, %c0_31] : memref<2x256xf32, #tpu.memory_space<vmem>>, vector<2x256xf32>
    tpu.vector_store %arg4[%c0_30, %c0_31], %189 {strides = array<i32>} : memref<2x256xf32, #tpu.memory_space<vmem>>, vector<2x256xf32>,
    return
  }
  func.func @transform_0(%arg0: i32) -> (i32, i32, i32) {
    %c0_i32 = arith.constant 0 : i32
    %c0_i32_0 = arith.constant 0 : i32
    %c0_i32_1 = arith.constant 0 : i32
    return %arg0, %c0_i32, %c0_i32_0 : i32, i32, i32
  }
  func.func @transform_1(%arg0: i32) -> i32 {
    %c0_i32 = arith.constant 0 : i32
    %c0_i32_0 = arith.constant 0 : i32
    return %c0_i32 : i32
  }
  func.func @transform_2(%arg0: i32) -> (i32, i32) {
    %c0_i32 = arith.constant 0 : i32
    %c0_i32_0 = arith.constant 0 : i32
    %c0_i32_1 = arith.constant 0 : i32
    return %c0_i32, %c0_i32_0 : i32, i32
  }
  func.func @transform_3(%arg0: i32) -> (i32, i32) {
    %c0_i32 = arith.constant 0 : i32
    %c0_i32_0 = arith.constant 0 : i32
    return %arg0, %c0_i32 : i32, i32
  }
}

</mosaic_0001>

<bundles_post_ra>
// kernel: tpu_custom_call.1
= control target key start
LH: loop header
LB: loop body
LE: loop exit
PB: predicated region body
PF: predicated region fallthrough
CT: control target
= control target key end

     0   :  { %8 = vsyncpa [#allocation3], 0  ;;  %s1192_s0 = inlined_call_operand.hbm [shape: f32[2,4,256], index: 0, kind: input, shape index: {}]   ;;  %s1193_s1 = inlined_call_operand.vmem [shape: f32[36], index: 1, kind: input, shape index: {}]   ;;  %s1194_s2 = inlined_call_operand.hbm [shape: f32[9,256], index: 2, kind: input, shape index: {}]   ;;  %s1195_s3 = inlined_call_operand.hbm [shape: f32[2,256], index: 3, kind: output, shape index: {}]  }
   0x1   :  { %9 = vsyncpa [#allocation5], 0 }
   0x2   :  { %10 = vsyncpa [#allocation8], 0 }
   0x3   :  { %11 = vsyncpa [#allocation4], 0  ;;  %s878_s12 = smov [#allocation2]   ;;  %s30_s16 = sshll.u32 %s1193_s1, 4  ;;  %s31_s16 = int_to_ptr.vmem [resolvable:$true] %s30_s16 }
   0x4   :  { %s17_s13 = sshll.u32 %s878_s12, 4  ;;  %s18_s13 = int_to_ptr.vmem [resolvable:$true] %s17_s13 }
   0x5   :  { %s806_s17 = scalar_lea.vmem %s18_s13, 256  ;;  %p811_p1 = scmp.lt.s32.totalorder %s18_s13, %s18_s13 }
   0x6   :  { %p807_p0 = scmp.ne.s32.totalorder %s18_s13, %s806_s17  ;;  %p812_p2 = scmp.lt.s32.totalorder %s806_s17, %s806_s17 }
   0x8   :  { %p813_p3 = por %p812_p2, %p811_p1 }
   0xa   :  { %p814_p4 = pnand %p813_p3, %p807_p0 }
   0xc   :  { %817 = shalt.err (!%p814_p4)
}
   0xd   :  { %s879_s18 = smov 128   ;;  %s880_s19 = smov 8  }
   0xe   :  { %23 = dma.hbm_to_vmem [thread:$0]  %s1192_s0, 256, %s18_s13, [#allocation3], %s879_s18, %s879_s18, %s880_s19  }
   0xf   :  { %s818_s22 = scalar_lea.vmem %s31_s16, 16  ;;  %p823_p6 = scmp.lt.s32.totalorder %s31_s16, %s31_s16 }
  0x10   :  { %p819_p5 = scmp.ne.s32.totalorder %s31_s16, %s818_s22  ;;  %p824_p7 = scmp.lt.s32.totalorder %s818_s22, %s818_s22 }
  0x12   :  { %p825_p8 = por %p824_p7, %p823_p6 }
  0x14   :  { %p826_p9 = pnand %p825_p8, %p819_p5 }
  0x16   :  { %829 = shalt.err (!%p826_p9)
}
  0x17   :  { %s881_s1 = smov [#allocation6]   ;;  %s882_s23 = smov [#allocation7]  }
  0x18   :  { %33 = dma.vmem_to_smem %s31_s16, 16, %s881_s1, [#allocation5]  }
  0x19   :  { %s39_s24 = sshll.u32 %s882_s23, 4  ;;  %s40_s24 = int_to_ptr.vmem [resolvable:$true] %s39_s24 }
  0x1a   :  { %s838_s25 = scalar_lea.vmem %s40_s24, 512  ;;  %p843_p11 = scmp.lt.s32.totalorder %s40_s24, %s40_s24 }
  0x1b   :  { %p839_p10 = scmp.ne.s32.totalorder %s40_s24, %s838_s25  ;;  %p844_p12 = scmp.lt.s32.totalorder %s838_s25, %s838_s25 }
  0x1d   :  { %p845_p13 = por %p844_p12, %p843_p11 }
  0x1f   :  { %p846_p0 = pnand %p845_p13, %p839_p10 }
  0x21   :  { %849 = shalt.err (!%p846_p0)
}
  0x22   :  { %s883_s0 = smov 256   ;;  %s884_s26 = smov 16  }
  0x23   :  { %45 = dma.hbm_to_vmem [thread:$0]  %s1194_s2, 512, %s40_s24, [#allocation8], %s883_s0, %s883_s0, %s884_s26  }
  0x24   :  { %870 = dma.done.wait [#allocation3], 256  }
  0x25   :  { %871 = vsyncadd [#allocation3], 4294967040 }
  0x26   :  { %872 = dma.done.wait [#allocation5], 16  }
  0x27   :  { %873 = vsyncadd [#allocation5], 4294967280 }
  0x28   :  { %874 = dma.done.wait [#allocation8], 512  }
  0x29   :  { %875 = vsyncadd [#allocation8], 4294966784 }
  0x2a   :  { %55 = sfence }
  0x2b   :  { %s742_s29 = sld [smem:[#allocation6 + $0x4]]  ;;  %v924_v0 = vld [vmem:[#allocation2] ss:$4 sm:$0x3]  ;;  %v275_v3 = vlaneseq  ;;  %v885_v7 = vmov 1966171168  }
  0x2c   :  { %s751_s30 = sld [smem:[#allocation6 + $0x5]]  ;;  %v926_v1 = vld [vmem:[#allocation2 + $0x8] ss:$4 sm:$0x3]  ;;  %v273_v8 = vunpack.c.l.s4 %v885_v7  ;;  %s886_s1 = smov 17  }
  0x2d   :  { %v928_v2 = vld [vmem:[#allocation2 + $0x1] ss:$4 sm:$0x3]  ;;  %s760_s4 = sld [smem:[#allocation6 + $0x6]]  ;;  %v945_v13 = vshrl.u32 %v275_v3, 7 }
  0x2e   :  { %v930_v4 = vld [vmem:[#allocation2 + $0x9] ss:$4 sm:$0x3]  ;;  %s932_s2 = sld [smem:[#allocation6 + $0x7]]  ;;  %v274_v17 = vunpack.c.0.s8 %v273_v8 }
  0x2f   :  { %s934_s5 = sld [smem:[#allocation6]]  ;;  %v936_v6 = vld [vmem:[#allocation2 + $0x2] ss:$4 sm:$0x3] }
  0x30   :  { %s938_s6 = sld [smem:[#allocation6 + $0x1]]  ;;  %v942_v12 = vld [vmem:[#allocation2 + $0xa] ss:$4 sm:$0x3]  ;;  %v965_v25 = vsub.s32 %v274_v17, %v945_v13 }
  0x31   :  { %v64_v5 = vstv %s742_s29  ;;  %s947_s7 = sld [smem:[#allocation6 + $0x2]]  ;;  %v951_v16 = vld [vmem:[#allocation2 + $0x3] ss:$4 sm:$0x3] }
  0x32   :  { %v65_v9 = vmul.f32 %v64_v5, %v924_v0  ;;  %v66_v10 = vmul.f32 %v64_v5, %v926_v1  ;;  %v106_v11 = vstv %s751_s30  ;;  %s953_s8 = sld [smem:[#allocation6 + $0x3]]  ;;  %v955_v19 = vld [vmem:[#allocation2 + $0xb] ss:$4 sm:$0x3] }
  0x33   :  { %v107_v14 = vmul.f32 %v106_v11, %v928_v2  ;;  %v108_v15 = vmul.f32 %v106_v11, %v930_v4  ;;  %v164_v18 = vstv %s760_s4  ;;  %s957_s9 = sld [smem:[#allocation6 + $0x8]] }
  0x34   :  { %v165_v22 = vmul.f32 %v164_v18, %v936_v6  ;;  %v166_v23 = vmul.f32 %v164_v18, %v942_v12  ;;  %s961_s10 = sld [smem:[#allocation6 + $0x9]]  ;;  %v222_v24 = vstv %s932_s2  ;;  %s888_s2 = smov 1  }
  0x35   :  { %v109_v20 = vadd.f32 %v107_v14, %v65_v9  ;;  %v110_v21 = vadd.f32 %v108_v15, %v66_v10  ;;  %v60_v26 = vstv %s934_s5  ;;  %s968_s11 = sld [smem:[#allocation6 + $0xa]]  ;;  %v223_v29 = vmul.f32 %v222_v24, %v951_v16 }
  0x36   :  { %v224_v30 = vmul.f32 %v222_v24, %v955_v19  ;;  %s972_s12 = sld [smem:[#allocation6 + $0xb]]  ;;  %v61_v31 = vmul.f32 %v60_v26, %v924_v0  ;;  %v62_v32 = vmul.f32 %v60_v26, %v926_v1  ;;  %v100_v33 = vstv %s938_s6  ;;  %s889_s6 = smov 127  }
  0x37   :  { %v167_v27 = vadd.f32 %v165_v22, %v109_v20  ;;  %v168_v28 = vadd.f32 %v166_v23, %v110_v21  ;;  %v158_v34 = vstv %s947_s7  ;;  %s978_s13 = sld [smem:[#allocation6 + $0xc]]  ;;  %v101_v37 = vmul.f32 %v100_v33, %v928_v2 }
  0x38   :  { %v102_v38 = vmul.f32 %v100_v33, %v930_v4  ;;  %s982_s14 = sld [smem:[#allocation6 + $0xd]]  ;;  %v159_v39 = vmul.f32 %v158_v34, %v936_v6  ;;  %v160_v40 = vmul.f32 %v158_v34, %v942_v12  ;;  %v216_v41 = vstv %s953_s8 }
  0x39   :  { %v225_v35 = vadd.f32 %v223_v29, %v167_v27  ;;  %v226_v36 = vadd.f32 %v224_v30, %v168_v28  ;;  %v68_v42 = vstv %s957_s9  ;;  %s988_s15 = sld [smem:[#allocation6 + $0xe]]  ;;  %v103_v44 = vadd.f32 %v101_v37, %v61_v31 }
  0x3a   :  { %v104_v45 = vadd.f32 %v102_v38, %v62_v32  ;;  %v217_v46 = vmul.f32 %v216_v41, %v951_v16  ;;  %s991_s16 = sld [smem:[#allocation6 + $0xf]]  ;;  %v218_v47 = vmul.f32 %v216_v41, %v955_v19  ;;  %v69_v48 = vmul.f32 %v68_v42, %v924_v0 }
  0x3b   :  { %v321_v43 = vcombine.low %v225_v35, %v226_v36  ;;  %v70_v49 = vmul.f32 %v68_v42, %v926_v1  ;;  %v112_v50 = vstv %s961_s10  ;;  %v161_v52 = vadd.f32 %v159_v39, %v103_v44  ;;  %s1003_s17 = sld [smem:[#allocation6 + $0x14]]  ;;  %s890_s10 = smov 113  }
  0x3c   :  { %v162_v53 = vadd.f32 %v160_v40, %v104_v45  ;;  %v113_v54 = vmul.f32 %v112_v50, %v928_v2  ;;  %v114_v55 = vmul.f32 %v112_v50, %v930_v4  ;;  %v170_v56 = vstv %s968_s11  ;;  %s1006_s18 = sld [smem:[#allocation6 + $0x15]] }
  0x3d   :  { %v328_v51 = vrot.slane %v321_v43, %v965_v25  ;;  %v228_v57 = vstv %s972_s12  ;;  %v72_v58 = vstv %s978_s13  ;;  %v219_v60 = vadd.f32 %v217_v46, %v161_v52  ;;  %s1014_s19 = sld [smem:[#allocation6 + $0x16]]  ;;  %s891_s12 = smov 112  }
  0x3e   :  { %v220_v61 = vadd.f32 %v218_v47, %v162_v53  ;;  %v115_v63 = vadd.f32 %v113_v54, %v69_v48  ;;  %v116_v5 = vadd.f32 %v114_v55, %v70_v49  ;;  %v171_v7 = vmul.f32 %v170_v56, %v936_v6  ;;  %s1022_s20 = sld [smem:[#allocation6 + $0x17]]  ;;  %s892_s13 = smov 111  }
  0x3f   :  { %v336_v59 = vrot.slane %v328_v51, %v965_v25  ;;  %v329_v62 = vcombine.high %v328_v51, %v328_v51  ;;  %v172_v8 = vmul.f32 %v170_v56, %v942_v12  ;;  %v229_v11 = vmul.f32 %v228_v57, %v951_v16  ;;  %s1026_s21 = sld [smem:[#allocation6 + $0x18]] }
  0x40   :  { %v271_v9 = vcombine.low %v219_v60, %v220_v61  ;;  %v230_v14 = vmul.f32 %v228_v57, %v955_v19  ;;  %v173_v15 = vadd.f32 %v171_v7, %v115_v63  ;;  %v73_v18 = vmul.f32 %v72_v58, %v924_v0  ;;  %s1033_s22 = sld [smem:[#allocation6 + $0x19]] }
  0x41   :  { %346 = vrot.lane.b32.xlu1 %v336_v59, %s884_s26  ;;  %v343_v10 = vrot.slane %v329_v62, %v965_v25  ;;  %v174_v17 = vadd.f32 %v172_v8, %v116_v5  ;;  %v74_v20 = vmul.f32 %v72_v58, %v926_v1  ;;  %v118_v22 = vstv %s982_s14  ;;  %s1042_s23 = sld [smem:[#allocation6 + $0x1a]]  ;;  %s893_s14 = smov [#allocation9]  }
  0x42   :  { %v278_v21 = vrot.slane %v271_v9, %v965_v25  ;;  %v176_v23 = vstv %s988_s15  ;;  %v234_v24 = vstv %s991_s16  ;;  %v231_v26 = vadd.f32 %v229_v11, %v173_v15  ;;  %s1046_s24 = sld [smem:[#allocation6 + $0x1b]]  ;;  %s731_s15 = sshll.u32 %s893_s14, 4  ;;  %s732_s15 = int_to_ptr.vmem [resolvable:$true] %s731_s15 }
  0x43   :  { %v232_v27 = vadd.f32 %v230_v14, %v174_v17  ;;  %v119_v28 = vmul.f32 %v118_v22, %v928_v2  ;;  %v120_v29 = vmul.f32 %v118_v22, %v930_v4  ;;  %v177_v32 = vmul.f32 %v176_v23, %v936_v6  ;;  %s1053_s25 = sld [smem:[#allocation6 + $0x1c]]  ;;  %s850_s16 = scalar_lea.vmem %s732_s15, 64 }
  0x44   :  { %v286_v30 = vrot.slane %v278_v21, %v965_v25  ;;  %v279_v31 = vcombine.high %v278_v21, %v278_v21  ;;  %v178_v33 = vmul.f32 %v176_v23, %v942_v12  ;;  %v235_v37 = vmul.f32 %v234_v24, %v951_v16  ;;  %s1057_s0 = sld [smem:[#allocation6 + $0x1d]]  ;;  %p851_p1 = scmp.ne.s32.totalorder %s732_s15, %s850_s16 }
  0x45   :  { %348 = vrot.lane.b32.xlu1 %v343_v10, %s884_s26  ;;  %v372_v34 = vcombine.low %v231_v26, %v232_v27  ;;  %v121_v35 = vadd.f32 %v119_v28, %v73_v18  ;;  %v122_v36 = vadd.f32 %v120_v29, %v74_v20  ;;  %v236_v38 = vmul.f32 %v234_v24, %v955_v19  ;;  %s887_s26 = smov 15   ;;  %s1064_s27 = sld [smem:[#allocation6 + $0x1e]] }
  0x46   :  { %296 = vrot.lane.b32.xlu0 %v286_v30, %s886_s1  ;;  %v1038_v39 = vrot.slane %v279_v31, %v965_v25  ;;  %v80_v40 = vstv %s1003_s17  ;;  %v130_v41 = vstv %s1006_s18  ;;  %v188_v49 = vstv %s1014_s19  ;;  %s1070_s28 = sld [smem:[#allocation6 + $0x1f]]  ;;  %p855_p2 = scmp.lt.s32.totalorder %s732_s15, %s732_s15 }
  0x47   :  { %v379_v42 = vrot.slane %v372_v34, %v965_v25  ;;  %v179_v43 = vadd.f32 %v177_v32, %v121_v35  ;;  %v180_v44 = vadd.f32 %v178_v33, %v122_v36  ;;  %v81_v45 = vmul.f32 %v80_v40, %v924_v0  ;;  %s1074_s29 = sld [smem:[#allocation6 + $0x20]]  ;;  %p856_p3 = scmp.lt.s32.totalorder %s850_s16, %s850_s16 }
  0x48   :  { %v82_v46 = vmul.f32 %v80_v40, %v926_v1  ;;  %v131_v47 = vmul.f32 %v130_v41, %v928_v2  ;;  %v132_v48 = vmul.f32 %v130_v41, %v930_v4  ;;  %v189_v56 = vmul.f32 %v188_v49, %v936_v6  ;;  %s1079_s30 = sld [smem:[#allocation6 + $0x21]] }
  0x49   :  { %v387_v50 = vrot.slane %v379_v42, %v965_v25  ;;  %v380_v51 = vcombine.high %v379_v42, %v379_v42  ;;  %v237_v52 = vadd.f32 %v235_v37, %v179_v43  ;;  %v238_v53 = vadd.f32 %v236_v38, %v180_v44  ;;  %s1082_s4 = sld [smem:[#allocation6 + $0x22]]  ;;  %p857_p4 = por %p856_p3, %p855_p2 }
  0x4a   :  { %v133_v54 = vadd.f32 %v131_v47, %v81_v45  ;;  %v134_v55 = vadd.f32 %v132_v48, %v82_v46  ;;  %v190_v57 = vmul.f32 %v188_v49, %v942_v12  ;;  %v246_v60 = vstv %s1022_s20  ;;  %s1088_s5 = sld [smem:[#allocation6 + $0x23]] }
  0x4b   :  { %397 = vrot.lane.b32.xlu0 %v387_v50, %s887_s26  ;;  %v394_v58 = vrot.slane %v380_v51, %v965_v25  ;;  %v423_v59 = vcombine.low %v237_v52, %v238_v53  ;;  %v84_v61 = vstv %s1026_s21  ;;  %v247_v5 = vmul.f32 %v246_v60, %v951_v16  ;;  %s1116_s7 = sld [smem:[#allocation6 + $0x10]]  ;;  %p858_p5 = pnand %p857_p4, %p851_p1 }
  0x4c   :  { %v191_v62 = vadd.f32 %v189_v56, %v133_v54  ;;  %v192_v63 = vadd.f32 %v190_v57, %v134_v55  ;;  %v248_v7 = vmul.f32 %v246_v60, %v955_v19  ;;  %v85_v9 = vmul.f32 %v84_v61, %v924_v0  ;;  %s754_s8 = sld [smem:[#allocation6 + $0x11]] }
  0x4d   :  { %399 = vrot.lane.b32.xlu1 %v394_v58, %s887_s26  ;;  %v430_v8 = vrot.slane %v423_v59, %v965_v25  ;;  %v86_v10 = vmul.f32 %v84_v61, %v926_v1  ;;  %v136_v11 = vstv %s1033_s22  ;;  %v194_v22 = vstv %s1042_s23  ;;  %s1122_s9 = sld [smem:[#allocation6 + $0x12]] }
  0x4e   :  { %v249_v14 = vadd.f32 %v247_v5, %v191_v62  ;;  %v250_v15 = vadd.f32 %v248_v7, %v192_v63  ;;  %v137_v17 = vmul.f32 %v136_v11, %v928_v2  ;;  %v138_v18 = vmul.f32 %v136_v11, %v930_v4  ;;  %s772_s11 = sld [smem:[#allocation6 + $0x13]] }
  0x4f   :  { %v438_v20 = vrot.slane %v430_v8, %v965_v25  ;;  %v431_v21 = vcombine.high %v430_v8, %v430_v8  ;;  %v252_v23 = vstv %s1046_s24  ;;  %v195_v28 = vmul.f32 %v194_v22, %v936_v6 }
  0x50   :  { %v503_v24 = vcombine.low %v249_v14, %v250_v15  ;;  %v139_v26 = vadd.f32 %v137_v17, %v85_v9  ;;  %v140_v27 = vadd.f32 %v138_v18, %v86_v10  ;;  %v196_v30 = vmul.f32 %v194_v22, %v942_v12 }
  0x51   :  { %448 = vrot.lane.b32.xlu0 %v438_v20, %s888_s2  ;;  %v445_v29 = vrot.slane %v431_v21, %v965_v25  ;;  %v253_v31 = vmul.f32 %v252_v23, %v951_v16  ;;  %v254_v32 = vmul.f32 %v252_v23, %v955_v19  ;;  %v88_v35 = vstv %s1053_s25 }
  0x52   :  { %v510_v33 = vrot.slane %v503_v24, %v965_v25  ;;  %v197_v34 = vadd.f32 %v195_v28, %v139_v26  ;;  %v142_v36 = vstv %s1057_s0  ;;  %v198_v37 = vadd.f32 %v196_v30, %v140_v27 }
  0x53   :  { %450 = vrot.lane.b32.xlu1 %v445_v29, %s888_s2  ;;  %v89_v38 = vmul.f32 %v88_v35, %v924_v0  ;;  %v90_v40 = vmul.f32 %v88_v35, %v926_v1  ;;  %v143_v41 = vmul.f32 %v142_v36, %v928_v2  ;;  %v144_v45 = vmul.f32 %v142_v36, %v930_v4 }
  0x54   :  { %v511_v42 = vcombine.high %v510_v33, %v510_v33  ;;  %v518_v43 = vrot.slane %v510_v33, %v965_v25  ;;  %v255_v44 = vadd.f32 %v253_v31, %v197_v34  ;;  %v256_v46 = vadd.f32 %v254_v32, %v198_v37 }
  0x55   :  { %298 = vrot.lane.b32.xlu0 %v1038_v39, %s886_s1  ;;  %v145_v47 = vadd.f32 %v143_v41, %v89_v38  ;;  %v200_v48 = vstv %s1064_s27  ;;  %v258_v49 = vstv %s1070_s28  ;;  %v146_v51 = vadd.f32 %v144_v45, %v90_v40 }
  0x56   :  { %v525_v50 = vrot.slane %v511_v42, %v965_v25  ;;  %v201_v52 = vmul.f32 %v200_v48, %v936_v6  ;;  %v202_v53 = vmul.f32 %v200_v48, %v942_v12  ;;  %v554_v54 = vcombine.low %v255_v44, %v256_v46 }
  0x57   :  { %v259_v55 = vmul.f32 %v258_v49, %v951_v16  ;;  %v260_v56 = vmul.f32 %v258_v49, %v955_v19  ;;  %v92_v39 = vstv %s1074_s29  ;;  %v148_v62 = vstv %s1079_s30 }
  0x58   :  { %530 = vrot.lane.b32.xlu1 %v525_v50, %s889_s6  ;;  %v203_v57 = vadd.f32 %v201_v52, %v145_v47  ;;  %v204_v58 = vadd.f32 %v202_v53, %v146_v51  ;;  %v93_v59 = vmul.f32 %v92_v39, %v924_v0  ;;  %v94_v60 = vmul.f32 %v92_v39, %v926_v1 }
  0x59   :  { %528 = vrot.lane.b32.xlu0 %v518_v43, %s889_s6  ;;  %v561_v61 = vrot.slane %v554_v54, %v965_v25  ;;  %v206_v63 = vstv %s1082_s4  ;;  %v264_v5 = vstv %s1088_s5  ;;  %v149_v9 = vmul.f32 %v148_v62, %v928_v2 }
  0x5a   :  { %v261_v7 = vadd.f32 %v259_v55, %v203_v57  ;;  %v262_v8 = vadd.f32 %v260_v56, %v204_v58  ;;  %v150_v10 = vmul.f32 %v148_v62, %v930_v4  ;;  %v207_v15 = vmul.f32 %v206_v63, %v936_v6  ;;  %v354_v57 = vld [vmem:[#allocation7 + $0x1] ss:$8 sm:$0x3] }
  0x5b   :  { %v562_v11 = vcombine.high %v561_v61, %v561_v61  ;;  %v569_v14 = vrot.slane %v561_v61, %v965_v25  ;;  %v208_v17 = vmul.f32 %v206_v63, %v942_v12  ;;  %v151_v20 = vadd.f32 %v149_v9, %v93_v59 }
  0x5c   :  { %v605_v18 = vcombine.low %v261_v7, %v262_v8  ;;  %v152_v21 = vadd.f32 %v150_v10, %v94_v60  ;;  %v265_v22 = vmul.f32 %v264_v5, %v951_v16  ;;  %v266_v24 = vmul.f32 %v264_v5, %v955_v19  ;;  %v405_v8 = vld [vmem:[#allocation7 + $0x2] ss:$8 sm:$0x3] }
  0x5d   :  { %v576_v23 = vrot.slane %v562_v11, %v965_v25  ;;  %579 = vrot.lane.b32.xlu0 %v569_v14, %s890_s10  ;;  %v209_v27 = vadd.f32 %v207_v15, %v151_v20  ;;  %v76_v35 = vstv %s1116_s7  ;;  %v124_v36 = vstv %s754_s8 }
  0x5e   :  { %v612_v26 = vrot.slane %v605_v18, %v965_v25  ;;  %v210_v28 = vadd.f32 %v208_v17, %v152_v21  ;;  %v77_v38 = vmul.f32 %v76_v35, %v924_v0  ;;  %v78_v40 = vmul.f32 %v76_v35, %v926_v1  ;;  %v456_v17 = vld [vmem:[#allocation7 + $0x3] ss:$8 sm:$0x3]  ;;  %v305_v21 = vld [vmem:[#allocation7] ss:$8 sm:$0x3] }
  0x5f   :  { %581 = vrot.lane.b32.xlu1 %v576_v23, %s890_s10  ;;  %v267_v31 = vadd.f32 %v265_v22, %v209_v27  ;;  %v125_v41 = vmul.f32 %v124_v36, %v928_v2  ;;  %v126_v42 = vmul.f32 %v124_v36, %v930_v4  ;;  %v182_v43 = vstv %s1122_s9 }
  0x60   :  { %v613_v29 = vcombine.high %v612_v26, %v612_v26  ;;  %v620_v30 = vrot.slane %v612_v26, %v965_v25  ;;  %v268_v32 = vadd.f32 %v266_v24, %v210_v28  ;;  %v240_v44 = vstv %s772_s11 }
  0x61   :  { %v127_v47 = vadd.f32 %v125_v41, %v77_v38  ;;  %v183_v48 = vmul.f32 %v182_v43, %v936_v6  ;;  %v128_v49 = vadd.f32 %v126_v42, %v78_v40  ;;  %v184_v50 = vmul.f32 %v182_v43, %v942_v12 }
  0x62   :  { %v627_v33 = vrot.slane %v613_v29, %v965_v25  ;;  %630 = vrot.lane.b32.xlu0 %v620_v30, %s891_s12  ;;  %v656_v34 = vcombine.low %v267_v31, %v268_v32  ;;  %v241_v51 = vmul.f32 %v240_v44, %v951_v16  ;;  %v242_v0 = vmul.f32 %v240_v44, %v955_v19  ;;  %v536_v31 = vld [vmem:[#allocation7 + $0x5] ss:$8 sm:$0x3] }
  0x63   :  { %v185_v2 = vadd.f32 %v183_v48, %v127_v47  ;;  %v186_v4 = vadd.f32 %v184_v50, %v128_v49  ;;  %v1153_v19 = vand.u32 127, %v275_v3  ;;  %v1156_v56 = vsub.s32 0, %v945_v13  ;;  %v587_v48 = vld [vmem:[#allocation7 + $0x6] ss:$8 sm:$0x3] }
  0x64   :  { %632 = vrot.lane.b32.xlu1 %v627_v33, %s891_s12  ;;  %v663_v37 = vrot.slane %v656_v34, %v965_v25  ;;  %v1159_v39 = vsub.s32 1, %v945_v13 }
  0x65   :  { %v243_v52 = vadd.f32 %v241_v51, %v185_v2  ;;  %v244_v53 = vadd.f32 %v242_v0, %v186_v4  ;;  %vm350_vm0 = vcmp.lt.s32.totalorder %v1153_v19, 16  ;;  %v359_v59 = vrot.slane %v354_v57, %v1156_v56 }
  0x66   :  { %v664_v45 = vcombine.high %v663_v37, %v663_v37  ;;  %v671_v46 = vrot.slane %v663_v37, %v965_v25  ;;  %v363_v60 = vrot.slane %v354_v57, %v1159_v39  ;;  %vm401_vm1 = vcmp.lt.s32.totalorder %v1153_v19, 15 }
  0x67   :  { %v474_v54 = vcombine.low %v243_v52, %v244_v53  ;;  %v410_v13 = vrot.slane %v405_v8, %v1156_v56  ;;  %v414_v10 = vrot.slane %v405_v8, %v1159_v39  ;;  %vm452_vm2 = vcmp.lt.s32.totalorder %v1153_v19, 1 }
  0x68   :  { %v678_v1 = vrot.slane %v664_v45, %v965_v25  ;;  %681 = vrot.lane.b32.xlu0 %v671_v46, %s892_s13  ;;  %v461_v23 = vrot.slane %v456_v17, %v1156_v56  ;;  %v465_v24 = vrot.slane %v456_v17, %v1159_v39  ;;  %vm302_vm3 = vcmp.lt.s32.totalorder %v1153_v19, 17 }
  0x69   :  { %v1143_v55 = vrot.slane %v474_v54, %v965_v25  ;;  %v310_v27 = vrot.slane %v305_v21, %v1156_v56  ;;  %v314_v28 = vrot.slane %v305_v21, %v1159_v39  ;;  %vm532_vm4 = vcmp.lt.s32.totalorder %v1153_v19, 127 }
  0x6a   :  { %683 = vrot.lane.b32.xlu1 %v678_v1, %s892_s13  ;;  %v541_v40 = vrot.slane %v536_v31, %v1156_v56  ;;  %v545_v41 = vrot.slane %v536_v31, %v1159_v39  ;;  %vm583_vm5 = vcmp.lt.s32.totalorder %v1153_v19, 113  ;;  %v592_v4 = vrot.slane %v587_v48, %v1156_v56 }
  0x6b   :  { %v482_v6 = vcombine.high %v1143_v55, %v1143_v55  ;;  %v489_v12 = vrot.slane %v1143_v55, %v965_v25  ;;  %v596_v52 = vrot.slane %v587_v48, %v1159_v39  ;;  %vm634_vm6 = vcmp.lt.s32.totalorder %v1153_v19, 112 }
  0x6c   :  { %vm685_vm7 = vcmp.lt.s32.totalorder %v1153_v19, 111 }
  0x6d   :  { %v1150_v16 = vrot.slane %v482_v6, %v965_v25 }
  0xb3   :  { %v347_v58 = vpop.permute.xlu1 %346 }
  0xb7   :  { %v349_v61 = vpop.permute.xlu1 %348 }
  0xb8   :  { %v351_v62 = vsel %vm350_vm0, %v347_v58, %v349_v61  ;;  %v352_v63 = vsel %vm350_vm0, %v349_v61, %v347_v58  ;;  %v297_v5 = vpop.permute.xlu0 %296  ;;  %v638_v58 = vld [vmem:[#allocation7 + $0x7] ss:$8 sm:$0x3] }
  0xb9   :  { %v366_v3 = vmul.f32 %v359_v59, %v352_v63  ;;  %v367_v7 = vmul.f32 %v363_v60, %v351_v62 }
  0xbd   :  { %v398_v9 = vpop.permute.xlu0 %397 }
  0xbf   :  { %v400_v11 = vpop.permute.xlu1 %399 }
  0xc0   :  { %v402_v14 = vsel %vm401_vm1, %v398_v9, %v400_v11  ;;  %v403_v15 = vsel %vm401_vm1, %v400_v11, %v398_v9 }
  0xc1   :  { %v417_v18 = vmul.f32 %v410_v13, %v403_v15  ;;  %v418_v20 = vmul.f32 %v414_v10, %v402_v14  ;;  %v689_v13 = vld [vmem:[#allocation7 + $0x10] ss:$8 sm:$0x3] }
  0xc2   :  { %v694_v17 = vrot.slane %v689_v13, %v1156_v56 }
  0xc3   :  { %v449_v22 = vpop.permute.xlu0 %448 }
  0xc5   :  { %v451_v26 = vpop.permute.xlu1 %450 }
  0xc6   :  { %v453_v29 = vsel %vm452_vm2, %v449_v22, %v451_v26  ;;  %v454_v30 = vsel %vm452_vm2, %v451_v26, %v449_v22 }
  0xc7   :  { %v468_v32 = vmul.f32 %v461_v23, %v454_v30  ;;  %v469_v33 = vmul.f32 %v465_v24, %v453_v29  ;;  %v299_v34 = vpop.permute.xlu0 %298 }
  0xc8   :  { %v303_v35 = vsel %vm302_vm3, %v297_v5, %v299_v34  ;;  %v304_v36 = vsel %vm302_vm3, %v299_v34, %v297_v5 }
  0xc9   :  { %v317_v37 = vmul.f32 %v310_v27, %v304_v36  ;;  %v318_v38 = vmul.f32 %v314_v28, %v303_v35 }
  0xca   :  { %v531_v42 = vpop.permute.xlu1 %530 }
  0xcb   :  { %v368_v43 = vadd.f32 %v366_v3, %v317_v37  ;;  %v369_v44 = vadd.f32 %v367_v7, %v318_v38  ;;  %v529_v45 = vpop.permute.xlu0 %528  ;;  %v643_v3 = vrot.slane %v638_v58, %v1156_v56  ;;  %v647_v7 = vrot.slane %v638_v58, %v1159_v39 }
  0xcc   :  { %v533_v46 = vsel %vm532_vm4, %v529_v45, %v531_v42  ;;  %v534_v47 = vsel %vm532_vm4, %v531_v42, %v529_v45 }
  0xcd   :  { %v419_v49 = vadd.f32 %v417_v18, %v368_v43  ;;  %v420_v50 = vadd.f32 %v418_v20, %v369_v44  ;;  %v548_v51 = vmul.f32 %v541_v40, %v533_v46  ;;  %v549_v0 = vmul.f32 %v545_v41, %v534_v47 }
  0xce   :  { %v698_v18 = vrot.slane %v689_v13, %v1159_v39 }
  0xcf   :  { %v470_v1 = vadd.f32 %v468_v32, %v419_v49  ;;  %v471_v2 = vadd.f32 %v469_v33, %v420_v50  ;;  %v580_v53 = vpop.permute.xlu0 %579 }
  0xd1   :  { %v499_v54 = vadd.f32 %v489_v12, %v470_v1  ;;  %v500_v6 = vadd.f32 %v1150_v16, %v471_v2  ;;  %v582_v57 = vpop.permute.xlu1 %581 }
  0xd2   :  { %v584_v59 = vsel %vm583_vm5, %v580_v53, %v582_v57  ;;  %v585_v60 = vsel %vm583_vm5, %v582_v57, %v580_v53 }
  0xd3   :  { %v550_v61 = vadd.f32 %v548_v51, %v499_v54  ;;  %v551_v62 = vadd.f32 %v549_v0, %v500_v6  ;;  %v599_v63 = vmul.f32 %v592_v4, %v584_v59  ;;  %v600_v5 = vmul.f32 %v596_v52, %v585_v60 }
  0xd4   :  { %v631_v8 = vpop.permute.xlu0 %630 }
  0xd5   :  { %v601_v9 = vadd.f32 %v599_v63, %v550_v61  ;;  %v602_v25 = vadd.f32 %v600_v5, %v551_v62 }
  0xd6   :  { %v633_v55 = vpop.permute.xlu1 %632 }
  0xd7   :  { %v635_v12 = vsel %vm634_vm6, %v631_v8, %v633_v55  ;;  %v636_v16 = vsel %vm634_vm6, %v633_v55, %v631_v8 }
  0xd8   :  { %v650_v10 = vmul.f32 %v643_v3, %v635_v12  ;;  %v651_v11 = vmul.f32 %v647_v7, %v636_v16 }
  0xda   :  { %v652_v14 = vadd.f32 %v650_v10, %v601_v9  ;;  %v653_v15 = vadd.f32 %v651_v11, %v602_v25  ;;  %v682_v20 = vpop.permute.xlu0 %681 }
  0xdc   :  { %v684_v21 = vpop.permute.xlu1 %683 }
  0xdd   :  { %v686_v22 = vsel %vm685_vm7, %v682_v20, %v684_v21  ;;  %v687_v23 = vsel %vm685_vm7, %v684_v21, %v682_v20 }
  0xde   :  { %v701_v24 = vmul.f32 %v694_v17, %v686_v22  ;;  %v702_v26 = vmul.f32 %v698_v18, %v687_v23 }
  0xe0   :  { %v703_v27 = vadd.f32 %v701_v24, %v652_v14  ;;  %v704_v28 = vadd.f32 %v702_v26, %v653_v15 }
  0xe2   :  { %v705_v29 = vmul.f32 0.5, %v703_v27  ;;  %v706_v30 = vmul.f32 0.5, %v704_v28 }
  0xe4   :  { %794 = vtanh.f32 %v705_v29 }
  0xe5   :  { %796 = vtanh.f32 %v706_v30 }
  0xf1   :  { %v795_v31 = vpop.eup %794 }
  0xf2   :  { %v797_v19 = vpop.eup %796  ;;  %v709_v32 = vmul.f32 0.5, %v795_v31 }
  0xf3   :  { %v710_v33 = vmul.f32 0.5, %v797_v19 }
  0xf4   :  { %v711_v34 = vadd.f32 0.5, %v709_v32 }
  0xf5   :  { %v712_v56 = vadd.f32 0.5, %v710_v33 }
  0xf7   :  { %v715_v39 = vcombine.low %v711_v34, %v712_v56 }
  0xf9   :  { %777 = vst.sshfl [vmem:[#allocation9] sm:$0x33 pattern:$0x76325410] %v715_v39 }
  0xfa   :  { %861 = shalt.err (!%p858_p5)
}
  0xfb   :  { %734 = dma.vmem_to_hbm [thread:$0]  %s732_s15, 64, %s1195_s3, [#allocation4]  }
  0xfc   :  { %876 = dma.done.wait [#allocation4], 64  }
  0xfd   :  { %877 = vsyncadd [#allocation4], 4294967232 }
  0xfe   :  { %738 = vsyncpa [#allocation3], 1 }
  0xff   :  { %739 = vsyncpa [#allocation8], 1 }
 0x100   :  { %740 = vsyncpa [#allocation4], 1 }
 0x101   :  { %741 = vsyncpa [#allocation5], 1 }

</bundles_post_ra>
